<compile_context>
chip_gen: v7x
topology: tpu7x:2x2x1
jax: 0.10.0
libtpu: 0.0.40
codegen_flags: <defaults>
</compile_context>

<pallas_src>
import math
import jax
import jax.numpy as jnp
from jax.experimental import pallas as pl
from jax.experimental.pallas import tpu as pltpu  # noqa: F401  (TPU backend assumed)


# ---------------------------------------------------------------------------
# Helper: run a kernel on whole (small) arrays kept fully resident in VMEM.
# Block shapes equal the full array dims (grid=(1,)), satisfying the (8,128)
# rule trivially for these small synthetic shapes.
# ---------------------------------------------------------------------------
def _full_spec(shape):
    nd = len(shape)
    return pl.BlockSpec(shape, lambda i, nd=nd: (0,) * nd)


def _pcall(kernel, out_structs, *args):
    multi = isinstance(out_structs, (tuple, list))
    out_shape = tuple(out_structs) if multi else out_structs
    out_specs = (
        tuple(_full_spec(o.shape) for o in out_structs)
        if multi
        else _full_spec(out_structs.shape)
    )
    return pl.pallas_call(
        kernel,
        out_shape=out_shape,
        grid=(1,),
        in_specs=[_full_spec(a.shape) for a in args],
        out_specs=out_specs,
    )(*args)


# ---------------------------------------------------------------------------
# In-kernel helpers
# ---------------------------------------------------------------------------
def _gcn_relu(x, w_ref, adj_ref, b_ref):
    # relu(adj @ (x @ W) + b)
    support = jnp.dot(x, w_ref[...], preferred_element_type=jnp.float32)
    h = jnp.dot(adj_ref[...], support, preferred_element_type=jnp.float32)
    return jnp.maximum(h + b_ref[...], 0.0)


def _max_mean_slab(x):
    # [global_max_pool || global_mean_pool] built as one lane-dense (1, 2H) slab.
    inv_n = 1.0 / x.shape[0]  # static reciprocal (shape is compile-time)
    mx = jnp.max(x, axis=0, keepdims=True)
    mn = jnp.sum(x, axis=0, keepdims=True) * inv_n
    return jnp.concatenate([mx, mn], axis=-1)


# ---------------------------------------------------------------------------
# Fused Pallas kernels (3 per forward)
# ---------------------------------------------------------------------------
def gcn_score_kernel(x_ref, w_ref, adj_ref, b_ref, p_ref, h_ref, s_ref):
    # Layer 1: relu(gc1(x, adj)) and the TopKPooling score in one pass.
    h = _gcn_relu(x_ref[...], w_ref, adj_ref, b_ref)
    h_ref[...] = h
    # p_ref is already L2-normalized outside the kernel; VPU dot product.
    s_ref[...] = jnp.sum(h * p_ref[...], axis=-1, keepdims=True)


def scale_pool_gcn_score_kernel(
    xs_ref, s_ref, w_ref, adj_ref, b_ref, p_ref, pooled_ref, h_ref, score_ref
):
    # TopK rescale (x*tanh(score)) + graph readout + next GraphConv + next score.
    xp = xs_ref[...] * jnp.tanh(s_ref[...])
    pooled_ref[...] = _max_mean_slab(xp)
    h = _gcn_relu(xp, w_ref, adj_ref, b_ref)
    h_ref[...] = h
    score_ref[...] = jnp.sum(h * p_ref[...], axis=-1, keepdims=True)


def scale_pool_gcn_pool_kernel(xs_ref, s_ref, w_ref, adj_ref, b_ref, out_ref):
    # TopK rescale + readout2, gc3+relu, readout3; emits x2 + x3 directly.
    xp = xs_ref[...] * jnp.tanh(s_ref[...])
    x2 = _max_mean_slab(xp)
    h = _gcn_relu(xp, w_ref, adj_ref, b_ref)
    x3 = _max_mean_slab(h)
    out_ref[...] = x2 + x3


# ---------------------------------------------------------------------------
# Index plumbing kept in plain JAX (tiny arrays, between-layer boundary)
# ---------------------------------------------------------------------------
def topk_select(h, score, adj, batch, ratio=0.5):
    # TopKPooling selection (single-graph case): dense analogue adj[perm][:,perm].
    # TODO(synk): the row/col gather could be folded into the next fused kernel
    #             via PrefetchScalarGridSpec + pl.Element row gather; kept in
    #             JAX here since the arrays are a few KB.
    n = h.shape[0]
    k = int(math.ceil(ratio * n))
    s = score[:, 0]
    _, perm = jax.lax.top_k(s, k)
    return h[perm], s[perm][:, None], adj[perm][:, perm], batch[perm]


# ---------------------------------------------------------------------------
# Parameters (deterministic, shapes from the module __init__)
# ---------------------------------------------------------------------------
def init_params(key, nfeat, nhid):
    ks = jax.random.split(key, 8)

    def u(k, shape, fan_out):
        stdv = 1.0 / math.sqrt(fan_out)
        return jax.random.uniform(k, shape, jnp.float32, -stdv, stdv)

    return {
        "w1": u(ks[0], (nfeat, nhid), nhid), "b1": u(ks[1], (1, nhid), nhid),
        "w2": u(ks[2], (nhid, nhid), nhid),  "b2": u(ks[3], (1, nhid), nhid),
        "w3": u(ks[4], (nhid, nhid), nhid),  "b3": u(ks[5], (1, nhid), nhid),
        "p1": u(ks[6], (1, nhid), nhid),     # TopKPooling weight (1, nhid)
        "p2": u(ks[7], (1, nhid), nhid),
    }


# ---------------------------------------------------------------------------
# Forward pass mirroring GCN.forward
# ---------------------------------------------------------------------------
def gcn_forward(x, adj, batch, params):
    # TODO(synk): F.dropout implemented as identity (eval mode); training-mode
    #             masking would use pltpu.prng_seed + pltpu.prng_random_bits.
    # TODO(synk): gmp/gap assume a single graph (batch all zeros); multi-graph
    #             readout would need per-segment reductions.
    hdim = params["w1"].shape[1]
    # Per-forward constants: pre-normalize the pooling vectors (rsqrt, outside).
    p1n = params["p1"] * jax.lax.rsqrt(jnp.sum(params["p1"] * params["p1"]))
    p2n = params["p2"] * jax.lax.rsqrt(jnp.sum(params["p2"] * params["p2"]))

    # --- fused call 1: gc1 + relu + pool1 score ---
    n0 = x.shape[0]
    h1, s1 = _pcall(
        gcn_score_kernel,
        (jax.ShapeDtypeStruct((n0, hdim), jnp.float32),
         jax.ShapeDtypeStruct((n0, 1), jnp.float32)),
        x, params["w1"], adj, params["b1"], p1n,
    )
    xs1, ss1, adj1, batch = topk_select(h1, s1, adj, batch)

    # --- fused call 2: scale+readout1 + gc2 + relu + pool2 score ---
    n1 = xs1.shape[0]
    x1, h2, s2 = _pcall(
        scale_pool_gcn_score_kernel,
        (jax.ShapeDtypeStruct((1, 2 * hdim), jnp.float32),
         jax.ShapeDtypeStruct((n1, hdim), jnp.float32),
         jax.ShapeDtypeStruct((n1, 1), jnp.float32)),
        xs1, ss1, params["w2"], adj1, params["b2"], p2n,
    )
    xs2, ss2, adj2, batch = topk_select(h2, s2, adj1, batch)

    # --- fused call 3: scale+readout2 + gc3 + relu + readout3 (emits x2+x3) ---
    x23 = _pcall(
        scale_pool_gcn_pool_kernel,
        jax.ShapeDtypeStruct((1, 2 * hdim), jnp.float32),
        xs2, ss2, params["w3"], adj2, params["b3"],
    )

    return x1 + x23


if __name__ == "__main__":
    key = jax.random.PRNGKey(0)
    kx, ka, kp = jax.random.split(key, 3)

    N, nfeat, nhid = 16, 8, 32
    x = jax.random.normal(kx, (N, nfeat), jnp.float32)

    a = jax.random.uniform(ka, (N, N), jnp.float32)
    a = (a + a.T) * 0.5 + jnp.eye(N)
    adj = a / jnp.sum(a, axis=1, keepdims=True)   # row-normalized dense adjacency
    batch = jnp.zeros((N,), jnp.int32)            # single graph

    params = init_params(kp, nfeat, nhid)
    fwd = jax.jit(gcn_forward)
    out = fwd(x, adj, batch, params)
    jax.block_until_ready(out)

    assert out.shape == (1, 2 * nhid)
    assert bool(jnp.all(jnp.isfinite(out)))
    print("KERNEL_OK")
</pallas_src>

<mosaic_0001>
module attributes {stable_mosaic.version = 11 : i64} {
  func.func @gcn_score_kernel(%arg0: i32, %arg1: memref<16x8xf32, #tpu.memory_space<vmem>>, %arg2: memref<8x32xf32, #tpu.memory_space<vmem>>, %arg3: memref<16x16xf32, #tpu.memory_space<vmem>>, %arg4: memref<1x32xf32, #tpu.memory_space<vmem>>, %arg5: memref<1x32xf32, #tpu.memory_space<vmem>>, %arg6: memref<16x32xf32, #tpu.memory_space<vmem>>, %arg7: memref<16x1xf32, #tpu.memory_space<vmem>>) attributes {dimension_semantics = [#tpu.dimension_semantics<arbitrary>], iteration_bounds = array<i64: 1>, scalar_prefetch = 0 : i64, scratch_operands = 0 : i64, tpu.core_type = #tpu.core_type<tc>, window_params = [{pipeline_mode = #tpu.pipeline_mode<synchronous>, transform_indices = @transform_0, window_bounds = array<i64: 16, 8>}, {pipeline_mode = #tpu.pipeline_mode<synchronous>, transform_indices = @transform_1, window_bounds = array<i64: 8, 32>}, {pipeline_mode = #tpu.pipeline_mode<synchronous>, transform_indices = @transform_2, window_bounds = array<i64: 16, 16>}, {pipeline_mode = #tpu.pipeline_mode<synchronous>, transform_indices = @transform_3, window_bounds = array<i64: 1, 32>}, {pipeline_mode = #tpu.pipeline_mode<synchronous>, transform_indices = @transform_4, window_bounds = array<i64: 1, 32>}, {pipeline_mode = #tpu.pipeline_mode<synchronous>, transform_indices = @transform_5, window_bounds = array<i64: 16, 32>}, {pipeline_mode = #tpu.pipeline_mode<synchronous>, transform_indices = @transform_6, window_bounds = array<i64: 16, 1>}]} {
    %c0 = arith.constant 0 : index
    %c0_0 = arith.constant 0 : index
    %0 = vector.load %arg1[%c0, %c0_0] : memref<16x8xf32, #tpu.memory_space<vmem>>, vector<16x8xf32>
    %c0_1 = arith.constant 0 : index
    %c0_2 = arith.constant 0 : index
    %1 = vector.load %arg2[%c0_1, %c0_2] : memref<8x32xf32, #tpu.memory_space<vmem>>, vector<8x32xf32>
    %cst = arith.constant dense<0.000000e+00> : vector<16x32xf32>
    %2 = tpu.matmul %0, %1, %cst {dimension_numbers = #tpu.dot_dimension_numbers<[1], [0], [0], [1], [0, 0, 1, 1], [], []>} : vector<16x8xf32>, vector<8x32xf32>, vector<16x32xf32> -> vector<16x32xf32>
    %c0_3 = arith.constant 0 : index
    %c0_4 = arith.constant 0 : index
    %3 = vector.load %arg3[%c0_3, %c0_4] : memref<16x16xf32, #tpu.memory_space<vmem>>, vector<16x16xf32>
    %cst_5 = arith.constant dense<0.000000e+00> : vector<16x32xf32>
    %4 = tpu.matmul %3, %2, %cst_5 {dimension_numbers = #tpu.dot_dimension_numbers<[1], [0], [0], [1], [0, 0, 1, 1], [], []>} : vector<16x16xf32>, vector<16x32xf32>, vector<16x32xf32> -> vector<16x32xf32>
    %c0_6 = arith.constant 0 : index
    %c0_7 = arith.constant 0 : index
    %5 = vector.load %arg4[%c0_6, %c0_7] : memref<1x32xf32, #tpu.memory_space<vmem>>, vector<1x32xf32>
    %6 = vector.broadcast %5 : vector<1x32xf32> to vector<16x32xf32>
    %7 = arith.addf %4, %6 : vector<16x32xf32>
    %cst_8 = arith.constant 0.000000e+00 : f32
    %8 = vector.broadcast %cst_8 : f32 to vector<16x32xf32>
    %9 = arith.maximumf %7, %8 : vector<16x32xf32>
    %c0_9 = arith.constant 0 : index
    %c0_10 = arith.constant 0 : index
    %10 = vector.load %arg6[%c0_9, %c0_10] : memref<16x32xf32, #tpu.memory_space<vmem>>, vector<16x32xf32>
    tpu.vector_store %arg6[%c0_9, %c0_10], %9 {strides = array<i32>} : memref<16x32xf32, #tpu.memory_space<vmem>>, vector<16x32xf32>,
    %c0_11 = arith.constant 0 : index
    %c0_12 = arith.constant 0 : index
    %11 = vector.load %arg5[%c0_11, %c0_12] : memref<1x32xf32, #tpu.memory_space<vmem>>, vector<1x32xf32>
    %12 = vector.broadcast %11 : vector<1x32xf32> to vector<16x32xf32>
    %13 = arith.mulf %9, %12 : vector<16x32xf32>
    %cst_13 = arith.constant dense<0.000000e+00> : vector<16xf32>
    %14 = vector.multi_reduction <add>, %13, %cst_13 [1] : vector<16x32xf32> to vector<16xf32>
    %15 = vector.shape_cast %14 : vector<16xf32> to vector<16x1xf32>
    %c0_14 = arith.constant 0 : index
    %c0_15 = arith.constant 0 : index
    %16 = vector.load %arg7[%c0_14, %c0_15] : memref<16x1xf32, #tpu.memory_space<vmem>>, vector<16x1xf32>
    tpu.vector_store %arg7[%c0_14, %c0_15], %15 {strides = array<i32>} : memref<16x1xf32, #tpu.memory_space<vmem>>, vector<16x1xf32>,
    return
  }
  func.func @transform_0(%arg0: i32) -> (i32, i32) {
    %c0_i32 = arith.constant 0 : i32
    %c0_i32_0 = arith.constant 0 : i32
    %c0_i32_1 = arith.constant 0 : i32
    return %c0_i32, %c0_i32_0 : i32, i32
  }
  func.func @transform_1(%arg0: i32) -> (i32, i32) {
    %c0_i32 = arith.constant 0 : i32
    %c0_i32_0 = arith.constant 0 : i32
    %c0_i32_1 = arith.constant 0 : i32
    return %c0_i32, %c0_i32_0 : i32, i32
  }
  func.func @transform_2(%arg0: i32) -> (i32, i32) {
    %c0_i32 = arith.constant 0 : i32
    %c0_i32_0 = arith.constant 0 : i32
    %c0_i32_1 = arith.constant 0 : i32
    return %c0_i32, %c0_i32_0 : i32, i32
  }
  func.func @transform_3(%arg0: i32) -> (i32, i32) {
    %c0_i32 = arith.constant 0 : i32
    %c0_i32_0 = arith.constant 0 : i32
    %c0_i32_1 = arith.constant 0 : i32
    return %c0_i32, %c0_i32_0 : i32, i32
  }
  func.func @transform_4(%arg0: i32) -> (i32, i32) {
    %c0_i32 = arith.constant 0 : i32
    %c0_i32_0 = arith.constant 0 : i32
    %c0_i32_1 = arith.constant 0 : i32
    return %c0_i32, %c0_i32_0 : i32, i32
  }
  func.func @transform_5(%arg0: i32) -> (i32, i32) {
    %c0_i32 = arith.constant 0 : i32
    %c0_i32_0 = arith.constant 0 : i32
    %c0_i32_1 = arith.constant 0 : i32
    return %c0_i32, %c0_i32_0 : i32, i32
  }
  func.func @transform_6(%arg0: i32) -> (i32, i32) {
    %c0_i32 = arith.constant 0 : i32
    %c0_i32_0 = arith.constant 0 : i32
    %c0_i32_1 = arith.constant 0 : i32
    return %c0_i32, %c0_i32_0 : i32, i32
  }
}

module attributes {stable_mosaic.version = 11 : i64} {
  func.func @scale_pool_gcn_score_kernel(%arg0: i32, %arg1: memref<8x32xf32, #tpu.memory_space<vmem>>, %arg2: memref<8x1xf32, #tpu.memory_space<vmem>>, %arg3: memref<32x32xf32, #tpu.memory_space<vmem>>, %arg4: memref<8x8xf32, #tpu.memory_space<vmem>>, %arg5: memref<1x32xf32, #tpu.memory_space<vmem>>, %arg6: memref<1x32xf32, #tpu.memory_space<vmem>>, %arg7: memref<1x64xf32, #tpu.memory_space<vmem>>, %arg8: memref<8x32xf32, #tpu.memory_space<vmem>>, %arg9: memref<8x1xf32, #tpu.memory_space<vmem>>) attributes {dimension_semantics = [#tpu.dimension_semantics<arbitrary>], iteration_bounds = array<i64: 1>, scalar_prefetch = 0 : i64, scratch_operands = 0 : i64, tpu.core_type = #tpu.core_type<tc>, window_params = [{pipeline_mode = #tpu.pipeline_mode<synchronous>, transform_indices = @transform_0, window_bounds = array<i64: 8, 32>}, {pipeline_mode = #tpu.pipeline_mode<synchronous>, transform_indices = @transform_1, window_bounds = array<i64: 8, 1>}, {pipeline_mode = #tpu.pipeline_mode<synchronous>, transform_indices = @transform_2, window_bounds = array<i64: 32, 32>}, {pipeline_mode = #tpu.pipeline_mode<synchronous>, transform_indices = @transform_3, window_bounds = array<i64: 8, 8>}, {pipeline_mode = #tpu.pipeline_mode<synchronous>, transform_indices = @transform_4, window_bounds = array<i64: 1, 32>}, {pipeline_mode = #tpu.pipeline_mode<synchronous>, transform_indices = @transform_5, window_bounds = array<i64: 1, 32>}, {pipeline_mode = #tpu.pipeline_mode<synchronous>, transform_indices = @transform_6, window_bounds = array<i64: 1, 64>}, {pipeline_mode = #tpu.pipeline_mode<synchronous>, transform_indices = @transform_7, window_bounds = array<i64: 8, 32>}, {pipeline_mode = #tpu.pipeline_mode<synchronous>, transform_indices = @transform_8, window_bounds = array<i64: 8, 1>}]} {
    %c0 = arith.constant 0 : index
    %c0_0 = arith.constant 0 : index
    %0 = vector.load %arg1[%c0, %c0_0] : memref<8x32xf32, #tpu.memory_space<vmem>>, vector<8x32xf32>
    %c0_1 = arith.constant 0 : index
    %c0_2 = arith.constant 0 : index
    %1 = vector.load %arg2[%c0_1, %c0_2] : memref<8x1xf32, #tpu.memory_space<vmem>>, vector<8x1xf32>
    %2 = math.tanh %1 : vector<8x1xf32>
    %3 = vector.broadcast %2 : vector<8x1xf32> to vector<8x32xf32>
    %4 = arith.mulf %0, %3 : vector<8x32xf32>
    %cst = arith.constant dense<0xFF800000> : vector<32xf32>
    %5 = vector.multi_reduction <maximumf>, %4, %cst [0] : vector<8x32xf32> to vector<32xf32>
    %6 = vector.shape_cast %5 : vector<32xf32> to vector<1x32xf32>
    %cst_3 = arith.constant dense<0.000000e+00> : vector<32xf32>
    %7 = vector.multi_reduction <add>, %4, %cst_3 [0] : vector<8x32xf32> to vector<32xf32>
    %8 = vector.shape_cast %7 : vector<32xf32> to vector<1x32xf32>
    %cst_4 = arith.constant 1.250000e-01 : f32
    %9 = vector.broadcast %cst_4 : f32 to vector<1x32xf32>
    %10 = arith.mulf %8, %9 : vector<1x32xf32>
    %11 = tpu.concatenate %6, %10 in 1 : vector<1x32xf32>, vector<1x32xf32> -> vector<1x64xf32>
    %c0_5 = arith.constant 0 : index
    %c0_6 = arith.constant 0 : index
    %12 = vector.load %arg7[%c0_5, %c0_6] : memref<1x64xf32, #tpu.memory_space<vmem>>, vector<1x64xf32>
    tpu.vector_store %arg7[%c0_5, %c0_6], %11 {strides = array<i32>} : memref<1x64xf32, #tpu.memory_space<vmem>>, vector<1x64xf32>,
    %c0_7 = arith.constant 0 : index
    %c0_8 = arith.constant 0 : index
    %13 = vector.load %arg3[%c0_7, %c0_8] : memref<32x32xf32, #tpu.memory_space<vmem>>, vector<32x32xf32>
    %cst_9 = arith.constant dense<0.000000e+00> : vector<8x32xf32>
    %14 = tpu.matmul %4, %13, %cst_9 {dimension_numbers = #tpu.dot_dimension_numbers<[1], [0], [0], [1], [0, 0, 1, 1], [], []>} : vector<8x32xf32>, vector<32x32xf32>, vector<8x32xf32> -> vector<8x32xf32>
    %c0_10 = arith.constant 0 : index
    %c0_11 = arith.constant 0 : index
    %15 = vector.load %arg4[%c0_10, %c0_11] : memref<8x8xf32, #tpu.memory_space<vmem>>, vector<8x8xf32>
    %cst_12 = arith.constant dense<0.000000e+00> : vector<8x32xf32>
    %16 = tpu.matmul %15, %14, %cst_12 {dimension_numbers = #tpu.dot_dimension_numbers<[1], [0], [0], [1], [0, 0, 1, 1], [], []>} : vector<8x8xf32>, vector<8x32xf32>, vector<8x32xf32> -> vector<8x32xf32>
    %c0_13 = arith.constant 0 : index
    %c0_14 = arith.constant 0 : index
    %17 = vector.load %arg5[%c0_13, %c0_14] : memref<1x32xf32, #tpu.memory_space<vmem>>, vector<1x32xf32>
    %18 = vector.broadcast %17 : vector<1x32xf32> to vector<8x32xf32>
    %19 = arith.addf %16, %18 : vector<8x32xf32>
    %cst_15 = arith.constant 0.000000e+00 : f32
    %20 = vector.broadcast %cst_15 : f32 to vector<8x32xf32>
    %21 = arith.maximumf %19, %20 : vector<8x32xf32>
    %c0_16 = arith.constant 0 : index
    %c0_17 = arith.constant 0 : index
    %22 = vector.load %arg8[%c0_16, %c0_17] : memref<8x32xf32, #tpu.memory_space<vmem>>, vector<8x32xf32>
    tpu.vector_store %arg8[%c0_16, %c0_17], %21 {strides = array<i32>} : memref<8x32xf32, #tpu.memory_space<vmem>>, vector<8x32xf32>,
    %c0_18 = arith.constant 0 : index
    %c0_19 = arith.constant 0 : index
    %23 = vector.load %arg6[%c0_18, %c0_19] : memref<1x32xf32, #tpu.memory_space<vmem>>, vector<1x32xf32>
    %24 = vector.broadcast %23 : vector<1x32xf32> to vector<8x32xf32>
    %25 = arith.mulf %21, %24 : vector<8x32xf32>
    %cst_20 = arith.constant dense<0.000000e+00> : vector<8xf32>
    %26 = vector.multi_reduction <add>, %25, %cst_20 [1] : vector<8x32xf32> to vector<8xf32>
    %27 = vector.shape_cast %26 : vector<8xf32> to vector<8x1xf32>
    %c0_21 = arith.constant 0 : index
    %c0_22 = arith.constant 0 : index
    %28 = vector.load %arg9[%c0_21, %c0_22] : memref<8x1xf32, #tpu.memory_space<vmem>>, vector<8x1xf32>
    tpu.vector_store %arg9[%c0_21, %c0_22], %27 {strides = array<i32>} : memref<8x1xf32, #tpu.memory_space<vmem>>, vector<8x1xf32>,
    return
  }
  func.func @transform_0(%arg0: i32) -> (i32, i32) {
    %c0_i32 = arith.constant 0 : i32
    %c0_i32_0 = arith.constant 0 : i32
    %c0_i32_1 = arith.constant 0 : i32
    return %c0_i32, %c0_i32_0 : i32, i32
  }
  func.func @transform_1(%arg0: i32) -> (i32, i32) {
    %c0_i32 = arith.constant 0 : i32
    %c0_i32_0 = arith.constant 0 : i32
    %c0_i32_1 = arith.constant 0 : i32
    return %c0_i32, %c0_i32_0 : i32, i32
  }
  func.func @transform_2(%arg0: i32) -> (i32, i32) {
    %c0_i32 = arith.constant 0 : i32
    %c0_i32_0 = arith.constant 0 : i32
    %c0_i32_1 = arith.constant 0 : i32
    return %c0_i32, %c0_i32_0 : i32, i32
  }
  func.func @transform_3(%arg0: i32) -> (i32, i32) {
    %c0_i32 = arith.constant 0 : i32
    %c0_i32_0 = arith.constant 0 : i32
    %c0_i32_1 = arith.constant 0 : i32
    return %c0_i32, %c0_i32_0 : i32, i32
  }
  func.func @transform_4(%arg0: i32) -> (i32, i32) {
    %c0_i32 = arith.constant 0 : i32
    %c0_i32_0 = arith.constant 0 : i32
    %c0_i32_1 = arith.constant 0 : i32
    return %c0_i32, %c0_i32_0 : i32, i32
  }
  func.func @transform_5(%arg0: i32) -> (i32, i32) {
    %c0_i32 = arith.constant 0 : i32
    %c0_i32_0 = arith.constant 0 : i32
    %c0_i32_1 = arith.constant 0 : i32
    return %c0_i32, %c0_i32_0 : i32, i32
  }
  func.func @transform_6(%arg0: i32) -> (i32, i32) {
    %c0_i32 = arith.constant 0 : i32
    %c0_i32_0 = arith.constant 0 : i32
    %c0_i32_1 = arith.constant 0 : i32
    return %c0_i32, %c0_i32_0 : i32, i32
  }
  func.func @transform_7(%arg0: i32) -> (i32, i32) {
    %c0_i32 = arith.constant 0 : i32
    %c0_i32_0 = arith.constant 0 : i32
    %c0_i32_1 = arith.constant 0 : i32
    return %c0_i32, %c0_i32_0 : i32, i32
  }
  func.func @transform_8(%arg0: i32) -> (i32, i32) {
    %c0_i32 = arith.constant 0 : i32
    %c0_i32_0 = arith.constant 0 : i32
    %c0_i32_1 = arith.constant 0 : i32
    return %c0_i32, %c0_i32_0 : i32, i32
  }
}

module attributes {stable_mosaic.version = 11 : i64} {
  func.func @scale_pool_gcn_pool_kernel(%arg0: i32, %arg1: memref<4x32xf32, #tpu.memory_space<vmem>>, %arg2: memref<4x1xf32, #tpu.memory_space<vmem>>, %arg3: memref<32x32xf32, #tpu.memory_space<vmem>>, %arg4: memref<4x4xf32, #tpu.memory_space<vmem>>, %arg5: memref<1x32xf32, #tpu.memory_space<vmem>>, %arg6: memref<1x64xf32, #tpu.memory_space<vmem>>) attributes {dimension_semantics = [#tpu.dimension_semantics<arbitrary>], iteration_bounds = array<i64: 1>, scalar_prefetch = 0 : i64, scratch_operands = 0 : i64, tpu.core_type = #tpu.core_type<tc>, window_params = [{pipeline_mode = #tpu.pipeline_mode<synchronous>, transform_indices = @transform_0, window_bounds = array<i64: 4, 32>}, {pipeline_mode = #tpu.pipeline_mode<synchronous>, transform_indices = @transform_1, window_bounds = array<i64: 4, 1>}, {pipeline_mode = #tpu.pipeline_mode<synchronous>, transform_indices = @transform_2, window_bounds = array<i64: 32, 32>}, {pipeline_mode = #tpu.pipeline_mode<synchronous>, transform_indices = @transform_3, window_bounds = array<i64: 4, 4>}, {pipeline_mode = #tpu.pipeline_mode<synchronous>, transform_indices = @transform_4, window_bounds = array<i64: 1, 32>}, {pipeline_mode = #tpu.pipeline_mode<synchronous>, transform_indices = @transform_5, window_bounds = array<i64: 1, 64>}]} {
    %c0 = arith.constant 0 : index
    %c0_0 = arith.constant 0 : index
    %0 = vector.load %arg1[%c0, %c0_0] : memref<4x32xf32, #tpu.memory_space<vmem>>, vector<4x32xf32>
    %c0_1 = arith.constant 0 : index
    %c0_2 = arith.constant 0 : index
    %1 = vector.load %arg2[%c0_1, %c0_2] : memref<4x1xf32, #tpu.memory_space<vmem>>, vector<4x1xf32>
    %2 = math.tanh %1 : vector<4x1xf32>
    %3 = vector.broadcast %2 : vector<4x1xf32> to vector<4x32xf32>
    %4 = arith.mulf %0, %3 : vector<4x32xf32>
    %cst = arith.constant dense<0xFF800000> : vector<32xf32>
    %5 = vector.multi_reduction <maximumf>, %4, %cst [0] : vector<4x32xf32> to vector<32xf32>
    %6 = vector.shape_cast %5 : vector<32xf32> to vector<1x32xf32>
    %cst_3 = arith.constant dense<0.000000e+00> : vector<32xf32>
    %7 = vector.multi_reduction <add>, %4, %cst_3 [0] : vector<4x32xf32> to vector<32xf32>
    %8 = vector.shape_cast %7 : vector<32xf32> to vector<1x32xf32>
    %cst_4 = arith.constant 2.500000e-01 : f32
    %9 = vector.broadcast %cst_4 : f32 to vector<1x32xf32>
    %10 = arith.mulf %8, %9 : vector<1x32xf32>
    %11 = tpu.concatenate %6, %10 in 1 : vector<1x32xf32>, vector<1x32xf32> -> vector<1x64xf32>
    %c0_5 = arith.constant 0 : index
    %c0_6 = arith.constant 0 : index
    %12 = vector.load %arg3[%c0_5, %c0_6] : memref<32x32xf32, #tpu.memory_space<vmem>>, vector<32x32xf32>
    %cst_7 = arith.constant dense<0.000000e+00> : vector<4x32xf32>
    %13 = tpu.matmul %4, %12, %cst_7 {dimension_numbers = #tpu.dot_dimension_numbers<[1], [0], [0], [1], [0, 0, 1, 1], [], []>} : vector<4x32xf32>, vector<32x32xf32>, vector<4x32xf32> -> vector<4x32xf32>
    %c0_8 = arith.constant 0 : index
    %c0_9 = arith.constant 0 : index
    %14 = vector.load %arg4[%c0_8, %c0_9] : memref<4x4xf32, #tpu.memory_space<vmem>>, vector<4x4xf32>
    %cst_10 = arith.constant dense<0.000000e+00> : vector<4x32xf32>
    %15 = tpu.matmul %14, %13, %cst_10 {dimension_numbers = #tpu.dot_dimension_numbers<[1], [0], [0], [1], [0, 0, 1, 1], [], []>} : vector<4x4xf32>, vector<4x32xf32>, vector<4x32xf32> -> vector<4x32xf32>
    %c0_11 = arith.constant 0 : index
    %c0_12 = arith.constant 0 : index
    %16 = vector.load %arg5[%c0_11, %c0_12] : memref<1x32xf32, #tpu.memory_space<vmem>>, vector<1x32xf32>
    %17 = vector.broadcast %16 : vector<1x32xf32> to vector<4x32xf32>
    %18 = arith.addf %15, %17 : vector<4x32xf32>
    %cst_13 = arith.constant 0.000000e+00 : f32
    %19 = vector.broadcast %cst_13 : f32 to vector<4x32xf32>
    %20 = arith.maximumf %18, %19 : vector<4x32xf32>
    %cst_14 = arith.constant dense<0xFF800000> : vector<32xf32>
    %21 = vector.multi_reduction <maximumf>, %20, %cst_14 [0] : vector<4x32xf32> to vector<32xf32>
    %22 = vector.shape_cast %21 : vector<32xf32> to vector<1x32xf32>
    %cst_15 = arith.constant dense<0.000000e+00> : vector<32xf32>
    %23 = vector.multi_reduction <add>, %20, %cst_15 [0] : vector<4x32xf32> to vector<32xf32>
    %24 = vector.shape_cast %23 : vector<32xf32> to vector<1x32xf32>
    %cst_16 = arith.constant 2.500000e-01 : f32
    %25 = vector.broadcast %cst_16 : f32 to vector<1x32xf32>
    %26 = arith.mulf %24, %25 : vector<1x32xf32>
    %27 = tpu.concatenate %22, %26 in 1 : vector<1x32xf32>, vector<1x32xf32> -> vector<1x64xf32>
    %28 = arith.addf %11, %27 : vector<1x64xf32>
    %c0_17 = arith.constant 0 : index
    %c0_18 = arith.constant 0 : index
    %29 = vector.load %arg6[%c0_17, %c0_18] : memref<1x64xf32, #tpu.memory_space<vmem>>, vector<1x64xf32>
    tpu.vector_store %arg6[%c0_17, %c0_18], %28 {strides = array<i32>} : memref<1x64xf32, #tpu.memory_space<vmem>>, vector<1x64xf32>,
    return
  }
  func.func @transform_0(%arg0: i32) -> (i32, i32) {
    %c0_i32 = arith.constant 0 : i32
    %c0_i32_0 = arith.constant 0 : i32
    %c0_i32_1 = arith.constant 0 : i32
    return %c0_i32, %c0_i32_0 : i32, i32
  }
  func.func @transform_1(%arg0: i32) -> (i32, i32) {
    %c0_i32 = arith.constant 0 : i32
    %c0_i32_0 = arith.constant 0 : i32
    %c0_i32_1 = arith.constant 0 : i32
    return %c0_i32, %c0_i32_0 : i32, i32
  }
  func.func @transform_2(%arg0: i32) -> (i32, i32) {
    %c0_i32 = arith.constant 0 : i32
    %c0_i32_0 = arith.constant 0 : i32
    %c0_i32_1 = arith.constant 0 : i32
    return %c0_i32, %c0_i32_0 : i32, i32
  }
  func.func @transform_3(%arg0: i32) -> (i32, i32) {
    %c0_i32 = arith.constant 0 : i32
    %c0_i32_0 = arith.constant 0 : i32
    %c0_i32_1 = arith.constant 0 : i32
    return %c0_i32, %c0_i32_0 : i32, i32
  }
  func.func @transform_4(%arg0: i32) -> (i32, i32) {
    %c0_i32 = arith.constant 0 : i32
    %c0_i32_0 = arith.constant 0 : i32
    %c0_i32_1 = arith.constant 0 : i32
    return %c0_i32, %c0_i32_0 : i32, i32
  }
  func.func @transform_5(%arg0: i32) -> (i32, i32) {
    %c0_i32 = arith.constant 0 : i32
    %c0_i32_0 = arith.constant 0 : i32
    %c0_i32_1 = arith.constant 0 : i32
    return %c0_i32, %c0_i32_0 : i32, i32
  }
}

</mosaic_0001>

<bundles_post_ra>
// kernel: gcn_forward.3
= control target key start
LH: loop header
LB: loop body
LE: loop exit
PB: predicated region body
PF: predicated region fallthrough
CT: control target
= control target key end

     0   :  { %vm25_vm0 = vcmask 64512   ;;  %vm116_vm1 = vcmask 130048   ;;  %vm200_vm2 = vcmask 261120   ;;  %vm218_vm3 = vcmask 7168   ;;  %s326_s1 = inlined_call_operand.vmem [shape: f32[8,32], index: 1, kind: input, shape index: {}]   ;;  %s327_s0 = inlined_call_operand.vmem [shape: f32[16,8], index: 0, kind: input, shape index: {}]   ;;  %s328_s2 = inlined_call_operand.vmem [shape: f32[16,16], index: 2, kind: input, shape index: {}]   ;;  %s329_s3 = inlined_call_operand.vmem [shape: f32[1,32], index: 3, kind: input, shape index: {}]   ;;  %s330_s4 = inlined_call_operand.vmem [shape: f32[1,32], index: 4, kind: input, shape index: {}]   ;;  %s331_s5 = inlined_call_operand.vmem [shape: f32[16,32], index: 5, kind: output, shape index: {0}]   ;;  %s332_s6 = inlined_call_operand.vmem [shape: f32[16,1], index: 6, kind: output, shape index: {1}]  }
   0x1   :  { %v24_v0 = vld [vmem:[%s326_s1] sm:$0xff]  ;;  %v23_v2 = vld [vmem:[%s327_s0 + $0x8] sm:$0xff] }
   0x2   :  { %v22_v1 = vld [vmem:[%s327_s0] sm:$0xff]  ;;  %242 = vmatprep.subr.mxu0 %v24_v0  ;;  %v108_v7 = vld [vmem:[%s328_s2 + $0x8] sm:$0xff] }
   0x3   :  { %244 = vmatprep.mubr.msk.f32.mxu0 %vm25_vm0, %v22_v1  ;;  %243 = vmatpush3.msra.mxu0 %v24_v0  ;;  %v107_v3 = vld [vmem:[%s328_s2] sm:$0xff] }
   0x4   :  { %245 = vmatmul.mubr.msk.f32.vlgmr.msra.gmra.mrb[0].mxu0 %vm25_vm0, %v23_v2  ;;  %251 = vmatprep.mubr.msk.f32.mxu1 %vm116_vm1, %v107_v3  ;;  %v231_v8 = vld [vmem:[%s329_s3] ss:$0 sm:$0xff] }
   0x5   :  { %v234_v14 = vld [vmem:[%s330_s4] ss:$0 sm:$0xff] }
  0xd7   :  { %v246_v4 = vpop.f32.mrb[0].mxu0 }
  0xd8   :  { %v98_v5 = vpop.f32.mrb[1].mxu0 }
  0xd9   :  { %v254_v6 = vpack.c.bf16 %v246_v4, %v98_v5 }
  0xdb   :  { %255 = vmatprep.subr.bf16.mxu1 %v254_v6 }
  0xdc   :  { %257 = vmatpush3.bf16.msra.mxu1 %v254_v6 }
  0xdf   :  { %252 = vmatmul.mubr.msk.f32.vlgmr.msra.gmra.mrb[0].mxu1 %vm116_vm1, %v108_v7 }
 0x1b2   :  { %v253_v9 = vpop.f32.mrb[0].mxu1 }
 0x1b3   :  { %v195_v10 = vadd.f32 %v253_v9, %v231_v8  ;;  %v189_v11 = vpop.f32.mrb[1].mxu1 }
 0x1b4   :  { %v190_v12 = vadd.f32 %v231_v8, %v189_v11 }
 0x1b5   :  { %v199_v13 = vmax.f32 %v195_v10, 0.0 }
 0x1b6   :  { %v198_v15 = vmax.f32 %v190_v12, 0.0 }
 0x1b7   :  { %202 = vst.msk [vmem:[%s331_s5 + $0x8] sm:$0xff] %vm200_vm2, %v199_v13  ;;  %v211_v18 = vmul.f32 %v234_v14, %v199_v13 }
 0x1b8   :  { %v210_v16 = vmul.f32 %v234_v14, %v198_v15  ;;  %201 = vst.msk [vmem:[%s331_s5] sm:$0xff] %vm200_vm2, %v198_v15 }
 0x1b9   :  { %v215_v19 = vsel %vm200_vm2, %v211_v18, 0.0 }
 0x1ba   :  { %v212_v17 = vsel %vm200_vm2, %v210_v16, 0.0 }
 0x1bb   :  { %213 = vadd.xlane.f32.xlu0 %v212_v17 }
 0x1bf   :  { %216 = vadd.xlane.f32.xlu0 %v215_v19 }
 0x248   :  { %v214_v20 = vpop.xlane.xlu0 %213 }
 0x249   :  { %219 = vst.msk [vmem:[%s332_s6] sm:$0xff] %vm218_vm3, %v214_v20 }
 0x24c   :  { %v217_v21 = vpop.xlane.xlu0 %216 }
 0x24d   :  { %220 = vst.msk [vmem:[%s332_s6 + $0x8] sm:$0xff] %vm218_vm3, %v217_v21 }

// kernel: gcn_forward.4
= control target key start
LH: loop header
LB: loop body
LE: loop exit
PB: predicated region body
PF: predicated region fallthrough
CT: control target
= control target key end

     0   :  { %v285_v0 = vmov 0   ;;  %v286_v2 = vmov 0.0|0.0   ;;  %vm287_vm0 = vmmov 0   ;;  %v288_v10 = vmov 0.0   ;;  %s377_s1 = inlined_call_operand.vmem [shape: f32[8,1], index: 1, kind: input, shape index: {}]   ;;  %s378_s2 = inlined_call_operand.vmem [shape: f32[32,32], index: 2, kind: input, shape index: {}]   ;;  %s379_s0 = inlined_call_operand.vmem [shape: f32[8,32], index: 0, kind: input, shape index: {}]   ;;  %s380_s6 = inlined_call_operand.vmem [shape: f32[1,64], index: 6, kind: output, shape index: {0}]   ;;  %s381_s3 = inlined_call_operand.vmem [shape: f32[8,8], index: 3, kind: input, shape index: {}]   ;;  %s382_s4 = inlined_call_operand.vmem [shape: f32[1,32], index: 4, kind: input, shape index: {}]   ;;  %s383_s5 = inlined_call_operand.vmem [shape: f32[1,32], index: 5, kind: input, shape index: {}]   ;;  %s384_s7 = inlined_call_operand.vmem [shape: f32[8,32], index: 7, kind: output, shape index: {1}]   ;;  %s385_s8 = inlined_call_operand.vmem [shape: f32[8,1], index: 8, kind: output, shape index: {2}]  }
   0x1   :  { %282 = vset.pattern.permute.xlu0 %v285_v0  ;;  %v27_v1 = vld [vmem:[%s377_s1] sm:$0xff]  ;;  %271 = vmatprep.subr.bf16.mxu0 %v286_v2  ;;  %v59_v4 = vld [vmem:[%s378_s2 + $0x8] sm:$0xff]  ;;  %v60_v6 = vld [vmem:[%s378_s2 + $0x10] sm:$0xff]  ;;  %vm35_vm1 = vcmask 261120   ;;  %vm56_vm2 = vcmask 516096   ;;  %vm143_vm3 = vcmask 64512  }
   0x2   :  { %v58_v3 = vld [vmem:[%s378_s2] sm:$0xff]  ;;  %283 = vtanh.f32 %v27_v1  ;;  %v61_v7 = vld [vmem:[%s378_s2 + $0x18] sm:$0xff]  ;;  %263 = vmatprep.mubr.msk.f32.mxu0 %vm287_vm0, %v288_v10  ;;  %266 = vmatprep.subr.mxu1 %v288_v10  ;;  %s289_s2 = smov 32   ;;  %vm230_vm4 = vcmask 7168  }
   0x3   :  { %v272_v5 = vpack.c.bf16 %v59_v4, %v58_v3  ;;  %v275_v8 = vpack.c.bf16 %v61_v7, %v60_v6  ;;  %268 = vmatprep.mubr.msk.f32.mxu1 %vm287_vm0, %v288_v10  ;;  %v26_v11 = vld [vmem:[%s379_s0] sm:$0xff] }
   0x4   :  { %v135_v31 = vld [vmem:[%s381_s3] sm:$0xff] }
   0x5   :  { %273 = vmatpush3.bf16.msra.mxu0 %v272_v5  ;;  %v245_v34 = vld [vmem:[%s382_s4] ss:$0 sm:$0xff] }
   0x6   :  { %274 = vmatprep.subr.bf16.mxu0 %v286_v2  ;;  %v247_v38 = vld [vmem:[%s383_s5] ss:$0 sm:$0xff] }
   0x9   :  { %276 = vmatpush3.bf16.msra.mxu0 %v275_v8 }
   0xc   :  { %v284_v9 = vpop.eup %283 }
   0xd   :  { %31 = vperm.xlu0 %282, %v284_v9  }
  0x8c   :  { %v32_v12 = vpop.permute.xlu0 %31 }
  0x8d   :  { %v34_v13 = vmul.f32 %v32_v12, %v26_v11 }
  0x8f   :  { %v43_v14 = vsel %vm35_vm1, %v34_v13, 0.0  ;;  %264 = vmatmul.mubr.msk.f32.vlgmr.msra.gmra.mrb[0].mxu0 %vm35_vm1, %v34_v13  ;;  %v36_v22 = vsel %vm35_vm1, %v34_v13, -inf }
  0x90   :  { %v44_v15 = vrot.slane %v43_v14, 4  ;;  %v37_v23 = vrot.slane %v36_v22, 4 }
  0x92   :  { %v45_v16 = vadd.f32 %v44_v15, %v43_v14  ;;  %v38_v24 = vmax.f32 %v36_v22, %v37_v23 }
  0x94   :  { %v46_v17 = vrot.slane %v45_v16, 2  ;;  %v39_v25 = vrot.slane %v38_v24, 2 }
  0x96   :  { %v47_v18 = vadd.f32 %v46_v17, %v45_v16  ;;  %v40_v26 = vmax.f32 %v38_v24, %v39_v25 }
  0x98   :  { %v48_v19 = vrot.slane %v47_v18, 1  ;;  %v41_v27 = vrot.slane %v40_v26, 1 }
  0x9a   :  { %v49_v20 = vadd.f32 %v48_v19, %v47_v18  ;;  %v42_v28 = vmax.f32 %v40_v26, %v41_v27 }
  0x9c   :  { %v50_v21 = vmul.f32 0.125, %v49_v20 }
  0x9e   :  { %52 = vrot.lane.b32.xlu1 %v50_v21, %s289_s2 }
 0x110   :  { %v53_v29 = vpop.permute.xlu1 %52 }
 0x111   :  { %v55_v30 = vsel %vm35_vm1, %v42_v28, %v53_v29 }
 0x112   :  { %57 = vst.msk [vmem:[%s380_s6] sm:$0x1] %vm56_vm2, %v55_v30 }
 0x162   :  { %v131_v32 = vpop.f32.mrb[0].mxu0 }
 0x163   :  { %v265_v33 = vpop.f32.mrb[1].mxu0  ;;  %267 = vmatpush3.msra.mxu1 %v131_v32 }
 0x164   :  { %269 = vmatmul.mubr.msk.f32.vlgmr.msra.gmra.mrb[0].mxu1 %vm143_vm3, %v135_v31 }
 0x237   :  { %v213_v35 = vpop.f32.mrb[0].mxu1 }
 0x238   :  { %v214_v36 = vadd.f32 %v245_v34, %v213_v35  ;;  %v270_v37 = vpop.f32.mrb[1].mxu1 }
 0x23a   :  { %v217_v39 = vmax.f32 %v214_v36, 0.0 }
 0x23c   :  { %218 = vst.msk [vmem:[%s384_s7] sm:$0xff] %vm35_vm1, %v217_v39  ;;  %v226_v40 = vmul.f32 %v247_v38, %v217_v39 }
 0x23e   :  { %v227_v41 = vsel %vm35_vm1, %v226_v40, 0.0 }
 0x23f   :  { %228 = vadd.xlane.f32.xlu0 %v227_v41 }
 0x2cc   :  { %v229_v42 = vpop.xlane.xlu0 %228 }
 0x2cd   :  { %231 = vst.msk [vmem:[%s385_s8] sm:$0xff] %vm230_vm4, %v229_v42 }

// kernel: gcn_forward.5
= control target key start
LH: loop header
LB: loop body
LE: loop exit
PB: predicated region body
PF: predicated region fallthrough
CT: control target
= control target key end

     0   :  { %v283_v0 = vmov 0   ;;  %v284_v2 = vmov 0.0|0.0   ;;  %vm285_vm0 = vmmov 0   ;;  %v286_v10 = vmov 0.0   ;;  %s352_s1 = inlined_call_operand.vmem [shape: f32[4,1], index: 1, kind: input, shape index: {}]   ;;  %s353_s2 = inlined_call_operand.vmem [shape: f32[32,32], index: 2, kind: input, shape index: {}]   ;;  %s354_s0 = inlined_call_operand.vmem [shape: f32[4,32], index: 0, kind: input, shape index: {}]   ;;  %s355_s3 = inlined_call_operand.vmem [shape: f32[4,4], index: 3, kind: input, shape index: {}]   ;;  %s356_s4 = inlined_call_operand.vmem [shape: f32[1,32], index: 4, kind: input, shape index: {}]   ;;  %s357_s5 = inlined_call_operand.vmem [shape: f32[1,64], index: 5, kind: output, shape index: {}]  }
   0x1   :  { %280 = vset.pattern.permute.xlu0 %v283_v0  ;;  %v21_v1 = vld [vmem:[%s352_s1] sm:$0xf]  ;;  %269 = vmatprep.subr.bf16.mxu0 %v284_v2  ;;  %v52_v4 = vld [vmem:[%s353_s2 + $0x8] sm:$0xff]  ;;  %v53_v6 = vld [vmem:[%s353_s2 + $0x10] sm:$0xff]  ;;  %vm29_vm1 = vcmask 257024   ;;  %vm49_vm2 = vcmask 261120  }
   0x2   :  { %v51_v3 = vld [vmem:[%s353_s2] sm:$0xff]  ;;  %281 = vtanh.f32 %v21_v1  ;;  %v54_v7 = vld [vmem:[%s353_s2 + $0x18] sm:$0xff]  ;;  %261 = vmatprep.mubr.msk.f32.mxu0 %vm285_vm0, %v286_v10  ;;  %264 = vmatprep.subr.mxu1 %v286_v10  ;;  %s287_s2 = smov 32   ;;  %vm140_vm3 = vcmask 1043456   ;;  %vm136_vm4 = vcmask 31744   ;;  %vm236_vm5 = vcmask 516096  }
   0x3   :  { %v270_v5 = vpack.c.bf16 %v52_v4, %v51_v3  ;;  %v273_v8 = vpack.c.bf16 %v54_v7, %v53_v6  ;;  %266 = vmatprep.mubr.msk.f32.mxu1 %vm285_vm0, %v286_v10  ;;  %v20_v11 = vld [vmem:[%s354_s0] sm:$0xf] }
   0x4   :  { %v128_v22 = vld [vmem:[%s355_s3] sm:$0xf] }
   0x5   :  { %271 = vmatpush3.bf16.msra.mxu0 %v270_v5  ;;  %v243_v25 = vld [vmem:[%s356_s4] ss:$0 sm:$0xff] }
   0x6   :  { %272 = vmatprep.subr.bf16.mxu0 %v284_v2 }
   0x9   :  { %274 = vmatpush3.bf16.msra.mxu0 %v273_v8 }
   0xc   :  { %v282_v9 = vpop.eup %281 }
   0xd   :  { %25 = vperm.xlu0 %280, %v282_v9  }
  0x8c   :  { %v26_v12 = vpop.permute.xlu0 %25 }
  0x8d   :  { %v28_v13 = vmul.f32 %v26_v12, %v20_v11 }
  0x8f   :  { %v37_v14 = vsel %vm29_vm1, %v28_v13, 0.0  ;;  %262 = vmatmul.mubr.msk.f32.vlgmr.msra.gmra.mrb[0].mxu0 %vm49_vm2, %v28_v13  ;;  %v30_v38 = vsel %vm29_vm1, %v28_v13, -inf }
  0x90   :  { %v38_v15 = vrot.slane %v37_v14, 4  ;;  %v31_v40 = vrot.slane %v30_v38, 4 }
  0x92   :  { %v39_v16 = vadd.f32 %v38_v15, %v37_v14  ;;  %v32_v42 = vmax.f32 %v30_v38, %v31_v40 }
  0x94   :  { %v40_v17 = vrot.slane %v39_v16, 2  ;;  %v33_v44 = vrot.slane %v32_v42, 2 }
  0x96   :  { %v41_v18 = vadd.f32 %v40_v17, %v39_v16  ;;  %v34_v46 = vmax.f32 %v32_v42, %v33_v44 }
  0x98   :  { %v42_v19 = vrot.slane %v41_v18, 1  ;;  %v35_v48 = vrot.slane %v34_v46, 1 }
  0x9a   :  { %v43_v20 = vadd.f32 %v42_v19, %v41_v18  ;;  %v36_v51 = vmax.f32 %v34_v46, %v35_v48 }
  0x9c   :  { %v44_v21 = vmul.f32 0.25, %v43_v20 }
  0x9e   :  { %46 = vrot.lane.b32.xlu0 %v44_v21, %s287_s2 }
 0x110   :  { %v47_v50 = vpop.permute.xlu0 %46 }
 0x111   :  { %v50_v54 = vsel %vm49_vm2, %v36_v51, %v47_v50 }
 0x162   :  { %v124_v23 = vpop.f32.mrb[0].mxu0 }
 0x163   :  { %v263_v24 = vpop.f32.mrb[1].mxu0  ;;  %265 = vmatpush3.msk.msra.mxu1 %vm140_vm3, %v124_v23 }
 0x164   :  { %267 = vmatmul.mubr.msk.f32.vlgmr.msra.gmra.mrb[0].mxu1 %vm136_vm4, %v128_v22 }
 0x237   :  { %v210_v26 = vpop.f32.mrb[0].mxu1 }
 0x238   :  { %v211_v27 = vadd.f32 %v243_v25, %v210_v26  ;;  %v268_v28 = vpop.f32.mrb[1].mxu1 }
 0x23a   :  { %v214_v29 = vmax.f32 %v211_v27, 0.0 }
 0x23c   :  { %v222_v30 = vsel %vm29_vm1, %v214_v29, 0.0  ;;  %v215_v39 = vsel %vm29_vm1, %v214_v29, -inf }
 0x23d   :  { %v223_v31 = vrot.slane %v222_v30, 4  ;;  %v216_v41 = vrot.slane %v215_v39, 4 }
 0x23f   :  { %v224_v32 = vadd.f32 %v223_v31, %v222_v30  ;;  %v217_v43 = vmax.f32 %v215_v39, %v216_v41 }
 0x241   :  { %v225_v33 = vrot.slane %v224_v32, 2  ;;  %v218_v45 = vrot.slane %v217_v43, 2 }
 0x243   :  { %v226_v34 = vadd.f32 %v225_v33, %v224_v32  ;;  %v219_v47 = vmax.f32 %v217_v43, %v218_v45 }
 0x245   :  { %v227_v35 = vrot.slane %v226_v34, 1  ;;  %v220_v49 = vrot.slane %v219_v47, 1 }
 0x247   :  { %v228_v36 = vadd.f32 %v227_v35, %v226_v34  ;;  %v221_v52 = vmax.f32 %v219_v47, %v220_v49 }
 0x249   :  { %v229_v37 = vmul.f32 0.25, %v228_v36 }
 0x24b   :  { %231 = vrot.lane.b32.xlu1 %v229_v37, %s287_s2 }
 0x2bd   :  { %v232_v53 = vpop.permute.xlu1 %231 }
 0x2be   :  { %v234_v55 = vsel %vm49_vm2, %v221_v52, %v232_v53 }
 0x2bf   :  { %v235_v56 = vadd.f32 %v234_v55, %v50_v54 }
 0x2c1   :  { %237 = vst.msk [vmem:[%s357_s5] sm:$0x1] %vm236_vm5, %v235_v56 }

</bundles_post_ra>
